<compile_context>
chip_gen: v6e
topology: v6e:2x2x1
jax: 0.10.0
libtpu: 0.0.40
codegen_flags: <defaults>
</compile_context>

<pallas_src>
import jax
import jax.numpy as jnp
from jax.experimental import pallas as pl
from jax.experimental.pallas import tpu as pltpu


def _make_mse_sum_kernel(*, tile_rows, lanes, steps_per_core, valid_rows,
                         first_masked_block, total_steps, fold, scalar_out):
    """Builds the kernel with all static tile geometry closed over."""

    def kernel(a_ref, b_ref, o_ref, acc_ref):
        c = pl.program_id(0)                     # core (parallel) axis
        i = pl.program_id(1)                     # per-core step axis
        g = c * steps_per_core + i               # logical global block index

        @pl.when(i == 0)
        def _init():
            acc_ref[...] = jnp.zeros_like(acc_ref)

        d = a_ref[...].astype(jnp.float32) - b_ref[...].astype(jnp.float32)
        sq = d * d

        def accumulate(vals):
            if fold:
                # Fold 8-row groups onto the (8, lanes) accumulator: pure VPU
                # vreg adds (no XLU), ~2 vld per input vreg instead of 3vld+1vst.
                acc_ref[...] += vals.reshape(tile_rows // 8, 8, lanes).sum(axis=0)
            else:
                acc_ref[...] += vals

        if first_masked_block < total_steps:
            # Only the ragged last real block and/or the clamped duplicate
            # block(s) on the last core ever need masking; gate the mask so
            # steady-state steps run the plain accumulate.
            @pl.when(g >= first_masked_block)
            def _masked():
                row_ids = g * tile_rows + jax.lax.broadcasted_iota(
                    jnp.int32, sq.shape, 0)
                accumulate(jnp.where(row_ids < valid_rows, sq, 0.0))

            @pl.when(g < first_masked_block)
            def _plain():
                accumulate(sq)
        else:
            accumulate(sq)

        @pl.when(i == steps_per_core - 1)
        def _finalize():
            if scalar_out:
                # Single-core path: one cross-lane reduce to the SMEM scalar.
                o_ref[0, 0] = jnp.sum(acc_ref[...])
            else:
                # Per-core (8, 128) partial tile: fold lane-tiles together with
                # static vreg-aligned slices (pure VPU); wrapper sums the tiles.
                tot = acc_ref[:, 0:128]
                for t in range(1, lanes // 128):
                    tot = tot + acc_ref[:, t * 128:(t + 1) * 128]
                o_ref[...] = tot

    return kernel


def corsnorm(a, b, *, lanes=None, target_tile_bytes=6 * 1024 * 1024,
             num_cores=2):
    """sum((a - b)**2) over all elements, computed in a Pallas TPU kernel."""
    assert a.shape == b.shape, "Corsnorm requires matching shapes"
    total = int(a.size)
    if total == 0:
        return jnp.float32(0.0)

    af = a.reshape(-1)
    bf = b.reshape(-1)

    # Widest lane-dense last dim dividing the element count (free reshape).
    if lanes is None:
        lanes = 128
        for cand in (2048, 1024, 512, 256, 128):
            if total % cand == 0:
                lanes = cand
                break

    # Tail (< lanes elements) is reduced in plain JAX — no jnp.pad HBM copies.
    main = total - (total % lanes)
    tail_sum = None
    if main != total:
        dt = af[main:].astype(jnp.float32) - bf[main:].astype(jnp.float32)
        tail_sum = jnp.sum(dt * dt)
    if main == 0:
        return tail_sum

    rows = main // lanes
    a2 = af[:main].reshape(rows, lanes)
    b2 = bf[:main].reshape(rows, lanes)

    isz_a = jnp.dtype(a.dtype).itemsize
    isz_b = jnp.dtype(b.dtype).itemsize
    max_isz = max(isz_a, isz_b)
    # Packed-sublane tile: 8 rows for f32, 16 for bf16, 32 for int8/fp8.
    sub = max(8, 32 // max(1, min(isz_a, isz_b)))

    # ~target_tile_bytes per input per step, rows a multiple of `sub`.
    tile_rows = max(sub, (target_tile_bytes // (lanes * max_isz)) // sub * sub)
    if rows <= tile_rows:
        tile_rows = rows            # single full-extent block (always legal)

    num_blocks = pl.cdiv(rows, tile_rows)
    n_cores = num_cores if num_blocks >= 2 else 1
    steps_per_core = pl.cdiv(num_blocks, n_cores)
    total_steps = n_cores * steps_per_core
    ragged = (rows % tile_rows) != 0
    # Blocks with logical index >= this one contain rows that must be masked
    # (ragged tail of the array and/or clamped duplicates past num_blocks).
    first_masked_block = num_blocks - 1 if ragged else num_blocks

    fold = (tile_rows % 8 == 0) and (tile_rows >= 8)
    acc_rows = 8 if fold else tile_rows
    scalar_out = (n_cores == 1)

    kernel = _make_mse_sum_kernel(
        tile_rows=tile_rows, lanes=lanes, steps_per_core=steps_per_core,
        valid_rows=rows, first_masked_block=first_masked_block,
        total_steps=total_steps, fold=fold, scalar_out=scalar_out)

    def in_map(c, i):
        # Clamp so the trailing duplicate step(s) on the last core stay in
        # bounds; their contribution is fully masked in the kernel.
        return (jnp.minimum(c * steps_per_core + i, num_blocks - 1), 0)

    if scalar_out:
        out_shape = jax.ShapeDtypeStruct((1, 1), jnp.float32)
        out_spec = pl.BlockSpec((1, 1), lambda c, i: (0, 0),
                                memory_space=pltpu.SMEM)
        out_bytes = 4
    else:
        # One lane/sublane-aligned (8, 128) partial tile per core.
        out_shape = jax.ShapeDtypeStruct((n_cores * 8, 128), jnp.float32)
        out_spec = pl.BlockSpec((8, 128), lambda c, i: (c, 0))
        out_bytes = n_cores * 8 * 128 * 4

    cost = pl.CostEstimate(
        flops=3 * main,
        transcendentals=0,
        bytes_accessed=main * (isz_a + isz_b) + out_bytes,
    )

    out = pl.pallas_call(
        kernel,
        out_shape=out_shape,
        grid_spec=pltpu.PrefetchScalarGridSpec(
            num_scalar_prefetch=0,
            grid=(n_cores, steps_per_core),
            in_specs=[
                pl.BlockSpec((tile_rows, lanes), in_map),
                pl.BlockSpec((tile_rows, lanes), in_map),
            ],
            out_specs=out_spec,
            scratch_shapes=[pltpu.VMEM((acc_rows, lanes), jnp.float32)],
        ),
        compiler_params=pltpu.CompilerParams(
            # Core axis parallel (2x on v7x megacore, no-op on v5e/v6e);
            # per-core step axis is a sequential accumulation.
            dimension_semantics=("parallel", "arbitrary"),
            vmem_limit_bytes=40 * 1024 * 1024,
        ),
        cost_estimate=cost,
    )(a2, b2)

    result = out[0, 0] if scalar_out else jnp.sum(out)
    if tail_sum is not None:
        result = result + tail_sum
    return result


if __name__ == "__main__":
    key = jax.random.PRNGKey(0)
    ka, kb = jax.random.split(key)

    # 1) Primary check: small NCHW feature maps, default (large-tile) config.
    a = jax.random.normal(ka, (2, 4, 16, 16), dtype=jnp.float32)
    b = jax.random.normal(kb, (2, 4, 16, 16), dtype=jnp.float32)
    loss = jax.block_until_ready(corsnorm(a, b))
    ref = jnp.sum((a - b) ** 2)
    assert jnp.allclose(loss, ref, rtol=1e-5, atol=1e-5), (loss, ref)

    # 2) Tiny tiles: multi-block, 2-core split, ragged-block mask, clamped
    #    duplicate block, and the no-pad tail path (2400 % 128 = 96).
    a2 = jax.random.normal(ka, (2, 3, 20, 20), dtype=jnp.float32)
    b2 = jax.random.normal(kb, (2, 3, 20, 20), dtype=jnp.float32)
    loss2 = jax.block_until_ready(
        corsnorm(a2, b2, lanes=128, target_tile_bytes=8 * 128 * 4))
    ref2 = jnp.sum((a2 - b2) ** 2)
    assert jnp.allclose(loss2, ref2, rtol=1e-5, atol=1e-5), (loss2, ref2)

    # 3) Folded (8, lanes) accumulator + ragged mask + duplicate-step clamp.
    a3 = jax.random.normal(ka, (5120,), dtype=jnp.float32)
    b3 = jax.random.normal(kb, (5120,), dtype=jnp.float32)
    loss3 = jax.block_until_ready(
        corsnorm(a3, b3, lanes=128, target_tile_bytes=16 * 128 * 4))
    ref3 = jnp.sum((a3 - b3) ** 2)
    assert jnp.allclose(loss3, ref3, rtol=1e-5, atol=1e-5), (loss3, ref3)

    # 4) bf16 inputs: packed-sublane (16-row) tile alignment, 2-core split,
    #    folded accumulator, exact 2-block split (no masking).
    a4 = jax.random.normal(ka, (8, 8, 32, 32), dtype=jnp.bfloat16)
    b4 = jax.random.normal(kb, (8, 8, 32, 32), dtype=jnp.bfloat16)
    loss4 = jax.block_until_ready(
        corsnorm(a4, b4, target_tile_bytes=16 * 2048 * 2))
    ref4 = jnp.sum((a4.astype(jnp.float32) - b4.astype(jnp.float32)) ** 2)
    assert jnp.allclose(loss4, ref4, rtol=1e-4, atol=1e-4), (loss4, ref4)

    print("KERNEL_OK")
</pallas_src>

<mosaic_0001>
module attributes {stable_mosaic.version = 11 : i64} {
  func.func @kernel(%arg0: i32, %arg1: i32, %arg2: memref<1x2048xf32, #tpu.memory_space<vmem>>, %arg3: memref<1x2048xf32, #tpu.memory_space<vmem>>, %arg4: memref<1x1xf32, #tpu.memory_space<smem>>, %arg5: memref<1x2048xf32, #tpu.memory_space<vmem>>) attributes {dimension_semantics = [#tpu.dimension_semantics<parallel>, #tpu.dimension_semantics<arbitrary>], iteration_bounds = array<i64: 1, 1>, scalar_prefetch = 0 : i64, scratch_operands = 1 : i64, tpu.core_type = #tpu.core_type<tc>, window_params = [{transform_indices = @transform_0, window_bounds = array<i64: 1, 2048>}, {transform_indices = @transform_1, window_bounds = array<i64: 1, 2048>}, {transform_indices = @transform_2, window_bounds = array<i64: 1, 1>}]} {
    %c0_i32 = arith.constant 0 : i32
    %0 = arith.cmpi eq, %arg1, %c0_i32 : i32
    %1 = arith.extui %0 : i1 to i32
    %c0_i32_0 = arith.constant 0 : i32
    %2 = arith.cmpi ne, %1, %c0_i32_0 : i32
    scf.if %2 {
      %cst = arith.constant 0.000000e+00 : f32
      %13 = vector.broadcast %cst : f32 to vector<1x2048xf32>
      %c0_10 = arith.constant 0 : index
      %c0_11 = arith.constant 0 : index
      %14 = vector.load %arg5[%c0_10, %c0_11] : memref<1x2048xf32, #tpu.memory_space<vmem>>, vector<1x2048xf32>
      tpu.vector_store %arg5[%c0_10, %c0_11], %13 {strides = array<i32>} : memref<1x2048xf32, #tpu.memory_space<vmem>>, vector<1x2048xf32>,
    } else {
    }
    %c0 = arith.constant 0 : index
    %c0_1 = arith.constant 0 : index
    %3 = vector.load %arg2[%c0, %c0_1] : memref<1x2048xf32, #tpu.memory_space<vmem>>, vector<1x2048xf32>
    %c0_2 = arith.constant 0 : index
    %c0_3 = arith.constant 0 : index
    %4 = vector.load %arg3[%c0_2, %c0_3] : memref<1x2048xf32, #tpu.memory_space<vmem>>, vector<1x2048xf32>
    %5 = arith.subf %3, %4 : vector<1x2048xf32>
    %6 = arith.mulf %5, %5 : vector<1x2048xf32>
    %c0_4 = arith.constant 0 : index
    %c0_5 = arith.constant 0 : index
    %7 = vector.load %arg5[%c0_4, %c0_5] : memref<1x2048xf32, #tpu.memory_space<vmem>>, vector<1x2048xf32>
    %8 = arith.addf %7, %6 : vector<1x2048xf32>
    %c0_6 = arith.constant 0 : index
    %c0_7 = arith.constant 0 : index
    %9 = vector.load %arg5[%c0_6, %c0_7] : memref<1x2048xf32, #tpu.memory_space<vmem>>, vector<1x2048xf32>
    tpu.vector_store %arg5[%c0_6, %c0_7], %8 {strides = array<i32>} : memref<1x2048xf32, #tpu.memory_space<vmem>>, vector<1x2048xf32>,
    %c0_i32_8 = arith.constant 0 : i32
    %10 = arith.cmpi eq, %arg1, %c0_i32_8 : i32
    %11 = arith.extui %10 : i1 to i32
    %c0_i32_9 = arith.constant 0 : i32
    %12 = arith.cmpi ne, %11, %c0_i32_9 : i32
    scf.if %12 {
      %c0_10 = arith.constant 0 : index
      %c0_11 = arith.constant 0 : index
      %13 = vector.load %arg5[%c0_10, %c0_11] : memref<1x2048xf32, #tpu.memory_space<vmem>>, vector<1x2048xf32>
      %14 = vector.shape_cast %13 : vector<1x2048xf32> to vector<1x1x2048xf32>
      %cst = arith.constant dense<0.000000e+00> : vector<1xf32>
      %15 = vector.multi_reduction <add>, %14, %cst [1, 2] : vector<1x1x2048xf32> to vector<1xf32>
      %16 = vector.shape_cast %15 : vector<1xf32> to vector<1x1x1xf32>
      %17 = vector.extract %16[0, 0, 0] : f32 from vector<1x1x1xf32>
      %c0_12 = arith.constant 0 : index
      %c0_13 = arith.constant 0 : index
      %18 = memref.load %arg4[%c0_12, %c0_13] : memref<1x1xf32, #tpu.memory_space<smem>>
      memref.store %17, %arg4[%c0_12, %c0_13] : memref<1x1xf32, #tpu.memory_space<smem>>
    } else {
    }
    return
  }
  func.func @transform_0(%arg0: i32, %arg1: i32) -> (i32, i32) {
    %c1_i32 = arith.constant 1 : i32
    %0 = arith.muli %arg0, %c1_i32 : i32
    %1 = arith.addi %0, %arg1 : i32
    %c0_i32 = arith.constant 0 : i32
    %2 = arith.minsi %1, %c0_i32 : i32
    %c0_i32_0 = arith.constant 0 : i32
    %c0_i32_1 = arith.constant 0 : i32
    return %2, %c0_i32_0 : i32, i32
  }
  func.func @transform_1(%arg0: i32, %arg1: i32) -> (i32, i32) {
    %c1_i32 = arith.constant 1 : i32
    %0 = arith.muli %arg0, %c1_i32 : i32
    %1 = arith.addi %0, %arg1 : i32
    %c0_i32 = arith.constant 0 : i32
    %2 = arith.minsi %1, %c0_i32 : i32
    %c0_i32_0 = arith.constant 0 : i32
    %c0_i32_1 = arith.constant 0 : i32
    return %2, %c0_i32_0 : i32, i32
  }
  func.func @transform_2(%arg0: i32, %arg1: i32) -> (i32, i32) {
    %c0_i32 = arith.constant 0 : i32
    %c0_i32_0 = arith.constant 0 : i32
    %c0_i32_1 = arith.constant 0 : i32
    return %c0_i32, %c0_i32_0 : i32, i32
  }
}

</mosaic_0001>

<bundles_post_ra>
// kernel: tpu_custom_call.1
= control target key start
LH: loop header
LB: loop body
LE: loop exit
PB: predicated region body
PF: predicated region fallthrough
CT: control target
= control target key end

     0   :  { %7 = vsyncpa [#allocation4], 0  ;;  %s325_s0 = inlined_call_operand.hbm [shape: f32[1,2048], index: 0, kind: input, shape index: {}]   ;;  %s326_s1 = inlined_call_operand.hbm [shape: f32[1,2048], index: 1, kind: input, shape index: {}]   ;;  %s327_s2 = inlined_call_operand.hbm [shape: f32[1,1], index: 2, kind: output, shape index: {}]  }
   0x1   :  { %8 = vsyncpa [#allocation7], 0 }
   0x2   :  { %9 = vsyncpa [#allocation5], 0  ;;  %s282_s9 = smov [#allocation3]   ;;  %s283_s11 = smov [#allocation6]  }
   0x3   :  { %s22_s10 = sshll.u32 %s282_s9, 4  ;;  %s38_s12 = sshll.u32 %s283_s11, 4  ;;  %s23_s10 = int_to_ptr.vmem [resolvable:$true] %s22_s10  ;;  %s39_s12 = int_to_ptr.vmem [resolvable:$true] %s38_s12 }
   0x4   :  { %s236_s13 = scalar_lea.vmem %s23_s10, 256  ;;  %p241_p1 = scmp.lt.s32.totalorder %s23_s10, %s23_s10 }
   0x5   :  { %p237_p0 = scmp.ne.s32.totalorder %s23_s10, %s236_s13  ;;  %p242_p2 = scmp.lt.s32.totalorder %s236_s13, %s236_s13 }
   0x7   :  { %p243_p3 = por %p242_p2, %p241_p1 }
   0x9   :  { %p244_p4 = pnand %p243_p3, %p237_p0 }
   0xb   :  { %247 = shalt.err (!%p244_p4)
}
   0xc   :  { %25 = dma.hbm_to_vmem [thread:$0]  %s325_s0, 256, %s23_s10, [#allocation4]  }
   0xd   :  { %s256_s16 = scalar_lea.vmem %s39_s12, 256  ;;  %p261_p6 = scmp.lt.s32.totalorder %s39_s12, %s39_s12 }
   0xe   :  { %p257_p5 = scmp.ne.s32.totalorder %s39_s12, %s256_s16  ;;  %p262_p7 = scmp.lt.s32.totalorder %s256_s16, %s256_s16 }
  0x10   :  { %p263_p8 = por %p262_p7, %p261_p6 }
  0x12   :  { %p264_p9 = pnand %p263_p8, %p257_p5 }
  0x14   :  { %267 = shalt.err (!%p264_p9)
}
  0x15   :  { %41 = dma.hbm_to_vmem [thread:$0]  %s326_s1, 256, %s39_s12, [#allocation7]  }
  0x16   :  { %276 = dma.done.wait [#allocation4], 256  }
  0x17   :  { %277 = vsyncadd [#allocation4], 4294967040 }
  0x18   :  { %278 = dma.done.wait [#allocation7], 256  }
  0x19   :  { %279 = vsyncadd [#allocation7], 4294967040  ;;  %v81_v0 = vlaneseq  ;;  %v60_v2 = vld [vmem:[#allocation3] sm:$0xff]  ;;  %v62_v3 = vld [vmem:[#allocation6] sm:$0xff]  ;;  %vm161_vm0 = vcmask 1040384   ;;  %s284_s1 = smov [#allocation8]  }
  0x1a   :  { %v64_v4 = vsub.f32 %v60_v2, %v62_v3  ;;  %v61_v10 = vld [vmem:[#allocation3 + $0x8] sm:$0xff]  ;;  %v63_v11 = vld [vmem:[#allocation6 + $0x8] sm:$0xff] }
  0x1b   :  { %v82_v1 = vshrl.u32 %v81_v0, 7  ;;  %v65_v18 = vsub.f32 %v61_v10, %v63_v11 }
  0x1c   :  { %v66_v8 = vmul.f32 %v64_v4, %v64_v4 }
  0x1d   :  { %v83_v5 = vsub.s32 0, %v82_v1  ;;  %v87_v6 = vsub.s32 1, %v82_v1  ;;  %v91_v7 = vsub.s32 2, %v82_v1  ;;  %v95_v9 = vsub.s32 3, %v82_v1 }
  0x1e   :  { %v99_v15 = vsub.s32 4, %v82_v1  ;;  %v103_v17 = vsub.s32 5, %v82_v1  ;;  %v107_v19 = vsub.s32 6, %v82_v1  ;;  %v111_v26 = vsub.s32 7, %v82_v1 }
  0x1f   :  { %v84_v12 = vrot.slane %v66_v8, %v83_v5  ;;  %v88_v13 = vrot.slane %v66_v8, %v87_v6  ;;  %v92_v14 = vrot.slane %v66_v8, %v91_v7  ;;  %v96_v16 = vrot.slane %v66_v8, %v95_v9 }
  0x20   :  { %v100_v20 = vrot.slane %v66_v8, %v99_v15  ;;  %v104_v25 = vrot.slane %v66_v8, %v103_v17  ;;  %v67_v29 = vmul.f32 %v65_v18, %v65_v18  ;;  %v108_v30 = vrot.slane %v66_v8, %v107_v19 }
  0x21   :  { %v162_v21 = vsel %vm161_vm0, %v84_v12, 0.0  ;;  %v163_v22 = vsel %vm161_vm0, %v88_v13, 0.0  ;;  %v165_v23 = vsel %vm161_vm0, %v92_v14, 0.0  ;;  %v167_v27 = vsel %vm161_vm0, %v96_v16, 0.0 }
  0x22   :  { %v164_v24 = vadd.f32 %v163_v22, %v162_v21  ;;  %v169_v31 = vsel %vm161_vm0, %v100_v20, 0.0  ;;  %v112_v33 = vrot.slane %v66_v8, %v111_v26  ;;  %v171_v34 = vsel %vm161_vm0, %v104_v25, 0.0 }
  0x23   :  { %v116_v36 = vrot.slane %v67_v29, %v83_v5  ;;  %v173_v37 = vsel %vm161_vm0, %v108_v30, 0.0  ;;  %v120_v39 = vrot.slane %v67_v29, %v87_v6  ;;  %v124_v42 = vrot.slane %v67_v29, %v91_v7 }
  0x24   :  { %v166_v28 = vadd.f32 %v165_v23, %v164_v24  ;;  %v175_v40 = vsel %vm161_vm0, %v112_v33, 0.0  ;;  %v128_v45 = vrot.slane %v67_v29, %v95_v9  ;;  %v132_v48 = vrot.slane %v67_v29, %v99_v15 }
  0x25   :  { %v177_v43 = vsel %vm161_vm0, %v116_v36, 0.0  ;;  %v179_v46 = vsel %vm161_vm0, %v120_v39, 0.0  ;;  %v181_v49 = vsel %vm161_vm0, %v124_v42, 0.0  ;;  %v136_v51 = vrot.slane %v67_v29, %v103_v17 }
  0x26   :  { %v168_v32 = vadd.f32 %v167_v27, %v166_v28  ;;  %v183_v52 = vsel %vm161_vm0, %v128_v45, 0.0  ;;  %v140_v54 = vrot.slane %v67_v29, %v107_v19  ;;  %v185_v55 = vsel %vm161_vm0, %v132_v48, 0.0 }
  0x27   :  { %v144_v57 = vrot.slane %v67_v29, %v111_v26  ;;  %v187_v58 = vsel %vm161_vm0, %v136_v51, 0.0 }
  0x28   :  { %v170_v35 = vadd.f32 %v169_v31, %v168_v32  ;;  %v189_v60 = vsel %vm161_vm0, %v140_v54, 0.0 }
  0x29   :  { %v191_v62 = vsel %vm161_vm0, %v144_v57, 0.0 }
  0x2a   :  { %v172_v38 = vadd.f32 %v171_v34, %v170_v35 }
  0x2c   :  { %v174_v41 = vadd.f32 %v173_v37, %v172_v38 }
  0x2e   :  { %v176_v44 = vadd.f32 %v175_v40, %v174_v41 }
  0x30   :  { %v178_v47 = vadd.f32 %v177_v43, %v176_v44 }
  0x32   :  { %v180_v50 = vadd.f32 %v179_v46, %v178_v47 }
  0x34   :  { %v182_v53 = vadd.f32 %v181_v49, %v180_v50 }
  0x36   :  { %v184_v56 = vadd.f32 %v183_v52, %v182_v53 }
  0x38   :  { %v186_v59 = vadd.f32 %v185_v55, %v184_v56 }
  0x3a   :  { %v188_v61 = vadd.f32 %v187_v58, %v186_v59 }
  0x3c   :  { %v190_v63 = vadd.f32 %v189_v60, %v188_v61 }
  0x3e   :  { %v192_v0 = vadd.f32 %v191_v62, %v190_v63 }
  0x40   :  { %193 = vadd.xlane.f32.xlu0 %v192_v0 }
  0xc9   :  { %v194_v1 = vpop.xlane.xlu0 %193 }
  0xca   :  { %v195_v2 = vrot.slane %v194_v1, 4 }
  0xcc   :  { %v196_v3 = vadd.f32 %v195_v2, %v194_v1 }
  0xce   :  { %v197_v4 = vrot.slane %v196_v3, 2 }
  0xd0   :  { %v198_v5 = vadd.f32 %v197_v4, %v196_v3 }
  0xd2   :  { %v199_v6 = vrot.slane %v198_v5, 1 }
  0xd4   :  { %v200_v7 = vadd.f32 %v199_v6, %v198_v5 }
  0xd6   :  { %223 = vpush %v200_v7 }
 0x107   :  { %s224_s0 = spop %223 }
 0x108   :  { %203 = sst [smem:[#allocation8]] %s224_s0 }
 0x109   :  { %211 = dma.smem_to_hbm %s284_s1, 16, %s327_s2, [#allocation5]  }
 0x10a   :  { %280 = dma.done.wait [#allocation5], 16  }
 0x10b   :  { %281 = vsyncadd [#allocation5], 4294967280 }
 0x10c   :  { %215 = sfence }
 0x10d   :  { %216 = vsyncpa [#allocation4], 1 }
 0x10e   :  { %217 = vsyncpa [#allocation7], 1 }
 0x10f   :  { %218 = vsyncpa [#allocation5], 1 }

</bundles_post_ra>
